<compile_context>
chip_gen: v7x
topology: tpu7x:2x2x1
jax: 0.10.0
libtpu: 0.0.40
codegen_flags: <defaults>
</compile_context>

<pallas_src>
import numpy as np
import jax
import jax.numpy as jnp
from jax.experimental import pallas as pl
from jax.experimental.pallas import tpu as pltpu


# --------------------------------------------------------------------------
# Pallas kernels
# --------------------------------------------------------------------------
def _vmf_sample_kernel(mu_ref, v_ref, w_ref, out_ref):
    """sample_vMF hot path, vectorized over a batch tile.

    mu_ref  : (TB, D) f32 -- source_embed tile
    v_ref   : (TB, D) f32 -- standard Gaussian noise tile
    w_ref   : (TB, 1)  f32 -- per-row vMF weight
    out_ref : (TB, D)      -- sampled vectors on the unit sphere
    """
    mu = mu_ref[...]
    v = v_ref[...]
    w = w_ref[...]                                               # (TB, 1)

    # Three independent cross-lane reductions (short critical path, XLU).
    mu_mu = jnp.sum(mu * mu, axis=-1, keepdims=True)             # ||mu||^2
    mu_v = jnp.sum(mu * v, axis=-1, keepdims=True)               # mu . v
    v_v = jnp.sum(v * v, axis=-1, keepdims=True)                 # ||v||^2

    inv_munorm = jax.lax.rsqrt(jnp.maximum(mu_mu, 1e-30))        # EUP
    rescale = mu_v * inv_munorm                                  # mu_unit . v

    # ||v - rescale*mu_unit||^2 = ||v||^2 - rescale^2
    ortho_sq = jnp.maximum(v_v - rescale * rescale, 1e-20)
    scale_factr = jnp.sqrt(jnp.maximum(1.0 - w * w, 0.0))        # sqrt(1-w^2)

    # out = v_orth*scale_factr + mu_unit*w, with mu_unit / v_orth folded into
    # per-row scalars (no materialized (TB,D) temporaries beyond the output):
    c_v = jax.lax.rsqrt(ortho_sq) * scale_factr                  # (TB, 1)
    c_mu = inv_munorm * (w - rescale * c_v)                      # (TB, 1)
    out_ref[...] = (v * c_v + mu * c_mu).astype(out_ref.dtype)


def _renormalize_kernel(mu_ref, out_ref):
    """renormalize_norm: mu[i] / ||mu[i]|| (rsqrt, no divide)."""
    mu = mu_ref[...]
    inv = jax.lax.rsqrt(jnp.maximum(
        jnp.sum(mu * mu, axis=-1, keepdims=True), 1e-30))
    out_ref[...] = (mu * inv).astype(out_ref.dtype)


# --------------------------------------------------------------------------
# Tiling policy (VMEM- and D-aware)
# --------------------------------------------------------------------------
_PER_BLOCK_CAP = 2 << 20          # ~2 MiB per (tb, D) f32 block; safe on v7x


def _choose_batch_tile(B, D, itemsize=4, per_block_cap=_PER_BLOCK_CAP):
    """Return (tile_rows, padded_B).

    * Whole array fits the cap -> single block, grid of 1 (no per-step
      overhead on single-TC v5e/v6e, latency-bound small inputs).
    * Otherwise: largest 8-aligned tile under the cap; prefer a divisor of B,
      else pad B to a tile multiple (guarantees >=2 similar grid steps for
      v7x dual-TC sharding and keeps every block inside the VMEM budget).
    """
    full_bytes = B * D * itemsize
    if full_bytes <= per_block_cap or B <= 8:
        return B, B
    max_rows = max(8, ((per_block_cap // (D * itemsize)) // 8) * 8)
    tb = min(max_rows, (B // 8) * 8)
    t = tb
    while t >= 8:
        if B % t == 0:
            return t, B
        t -= 8
    b_pad = ((B + tb - 1) // tb) * tb
    return tb, b_pad


def _compiler_params(tb, D):
    block_bytes = tb * D * 4
    # ~3 double-buffered (tb,D) streams + w column + elementwise temps.
    vmem_limit = int(min(64 << 20, max(16 << 20, 12 * block_bytes)))
    return pltpu.CompilerParams(dimension_semantics=("parallel",),
                                vmem_limit_bytes=vmem_limit)


# --------------------------------------------------------------------------
# On-device vMF weight rejection sampler (vectorized, fixed draw count)
# --------------------------------------------------------------------------
def _sample_vmf_weight(key, kappa, dim, batch, max_draws=64):
    """Vectorized rejection sampler for the vMF mixing weight w.

    Same acceptance rule as the PyTorch per-row while-loop; here a fixed
    number of candidate draws per row is generated and the first accepted one
    is selected (acceptance probability is high, so max_draws=64 gives a
    vanishing failure probability; failures fall back to the mode).
    """
    d = dim - 1
    b = d / (np.sqrt(4.0 * kappa ** 2 + d ** 2) + 2.0 * kappa)
    x = (1.0 - b) / (1.0 + b)
    c = kappa * x + d * np.log(1.0 - x ** 2)

    kz, ku = jax.random.split(key)
    z = jax.random.beta(kz, d / 2.0, d / 2.0, shape=(max_draws, batch))
    u = jax.random.uniform(ku, shape=(max_draws, batch),
                           minval=1e-12, maxval=1.0)
    w_cand = (1.0 - (1.0 + b) * z) / (1.0 - (1.0 - b) * z)
    accept = kappa * w_cand + d * jnp.log(1.0 - x * w_cand) - c >= jnp.log(u)

    first = jnp.argmax(accept, axis=0)                      # first accepted
    w = w_cand[first, jnp.arange(batch)]
    w = jnp.where(jnp.any(accept, axis=0), w, jnp.float32(x))
    return jnp.clip(w, -1.0 + 1e-6, 1.0 - 1e-6).astype(jnp.float32)


# --------------------------------------------------------------------------
# Host-side wrappers around pallas_call
# --------------------------------------------------------------------------
def vmf_sample_pallas(mu, v, w, out_dtype=jnp.float32):
    """Batched vMF sample: mu (B,D), v (B,D) Gaussian noise, w (B,1)."""
    B, D = mu.shape
    tb, b_pad = _choose_batch_tile(B, D)
    mu = mu.astype(jnp.float32)
    v = v.astype(jnp.float32)
    w = w.astype(jnp.float32)
    if b_pad != B:
        pad = b_pad - B
        mu = jnp.pad(mu, ((0, pad), (0, 0)), constant_values=1.0)  # keep finite
        v = jnp.pad(v, ((0, pad), (0, 0)))
        w = jnp.pad(w, ((0, pad), (0, 0)))

    out = pl.pallas_call(
        _vmf_sample_kernel,
        out_shape=jax.ShapeDtypeStruct((b_pad, D), out_dtype),
        grid=(b_pad // tb,),
        in_specs=[pl.BlockSpec((tb, D), lambda i: (i, 0)),
                  pl.BlockSpec((tb, D), lambda i: (i, 0)),
                  pl.BlockSpec((tb, 1), lambda i: (i, 0))],
        out_specs=pl.BlockSpec((tb, D), lambda i: (i, 0)),
        compiler_params=_compiler_params(tb, D),
    )(mu, v, w)
    return out[:B] if b_pad != B else out


def renormalize_pallas(mu, out_dtype=jnp.float32):
    B, D = mu.shape
    tb, b_pad = _choose_batch_tile(B, D)
    mu = mu.astype(jnp.float32)
    if b_pad != B:
        mu = jnp.pad(mu, ((0, b_pad - B), (0, 0)), constant_values=1.0)

    out = pl.pallas_call(
        _renormalize_kernel,
        out_shape=jax.ShapeDtypeStruct((b_pad, D), out_dtype),
        grid=(b_pad // tb,),
        in_specs=[pl.BlockSpec((tb, D), lambda i: (i, 0))],
        out_specs=pl.BlockSpec((tb, D), lambda i: (i, 0)),
        compiler_params=_compiler_params(tb, D),
    )(mu)
    return out[:B] if b_pad != B else out


class VMFVAEWrapper:
    """JAX/Pallas port of the PyTorch VMFVAEWrapper (no learnable params)."""

    def __init__(self, kappa):
        self.kappa = kappa

    def kl_penalty(self, agenda):
        # PyTorch returns zeros(1) regardless of the input.
        return jnp.zeros((1,), dtype=jnp.float32)

    def forward(self, source_embed, add_noise=True, *, seed=0,
                out_dtype=jnp.float32):
        source_embed = jnp.asarray(source_embed, dtype=jnp.float32)
        B, D = source_embed.shape
        if add_noise:
            key = jax.random.PRNGKey(seed)
            kw, kv = jax.random.split(key)
            w = _sample_vmf_weight(kw, self.kappa, D, B).reshape(B, 1)
            noise = jax.random.normal(kv, (B, D), dtype=jnp.float32)
            sampled = vmf_sample_pallas(source_embed, noise, w, out_dtype)
            return sampled, self.kl_penalty(source_embed)
        else:
            # NOTE: original returned Python int 0 here; use a (1,) f32 zeros
            # array so both branches have consistent pytree structure.
            return (renormalize_pallas(source_embed, out_dtype),
                    jnp.zeros((1,), jnp.float32))

    __call__ = forward


# --------------------------------------------------------------------------
# Self-test
# --------------------------------------------------------------------------
if __name__ == "__main__":
    kappa = 100.0
    word_dim = 32
    id_dim = 2 * word_dim                      # 64

    key = jax.random.PRNGKey(0)
    model = VMFVAEWrapper(kappa)

    for batch in (4, 32):
        k = jax.random.fold_in(key, batch)
        source_embed = jax.random.normal(k, (batch, id_dim), dtype=jnp.float32)
        mu = np.asarray(source_embed)
        mu_unit = mu / np.linalg.norm(mu, axis=-1, keepdims=True)

        # ---- add_noise=True path ---------------------------------------
        sampled, kl = model(source_embed, add_noise=True, seed=0)
        sampled = jax.block_until_ready(sampled)
        kl = jax.block_until_ready(kl)
        assert sampled.shape == (batch, id_dim)
        assert kl.shape == (1,) and float(kl[0]) == 0.0

        s = np.asarray(sampled)
        # Invariants of the vMF construction:
        #   ||sampled|| == 1   and   <sampled, mu/||mu||> == w
        np.testing.assert_allclose(np.linalg.norm(s, axis=-1),
                                   np.ones(batch), rtol=1e-4, atol=1e-4)
        kw, _ = jax.random.split(jax.random.PRNGKey(0))
        w_chk = np.asarray(_sample_vmf_weight(kw, kappa, id_dim, batch))
        assert np.all(np.abs(w_chk) < 1.0)
        np.testing.assert_allclose(np.sum(s * mu_unit, axis=-1), w_chk,
                                   rtol=1e-4, atol=1e-4)

        # ---- add_noise=False path ---------------------------------------
        renorm, zero = model(source_embed, add_noise=False)
        renorm = jax.block_until_ready(renorm)
        np.testing.assert_allclose(np.asarray(renorm), mu_unit,
                                   rtol=1e-4, atol=1e-5)
        assert float(np.asarray(zero)[0]) == 0.0

    print("KERNEL_OK")
</pallas_src>

<mosaic_0001>
module attributes {stable_mosaic.version = 11 : i64} {
  func.func @_vmf_sample_kernel(%arg0: i32, %arg1: memref<4x64xf32, #tpu.memory_space<vmem>>, %arg2: memref<4x64xf32, #tpu.memory_space<vmem>>, %arg3: memref<4x1xf32, #tpu.memory_space<vmem>>, %arg4: memref<4x64xf32, #tpu.memory_space<vmem>>) attributes {dimension_semantics = [#tpu.dimension_semantics<parallel>], iteration_bounds = array<i64: 1>, scalar_prefetch = 0 : i64, scratch_operands = 0 : i64, tpu.core_type = #tpu.core_type<tc>, window_params = [{transform_indices = @transform_0, window_bounds = array<i64: 4, 64>}, {transform_indices = @transform_1, window_bounds = array<i64: 4, 64>}, {transform_indices = @transform_2, window_bounds = array<i64: 4, 1>}, {transform_indices = @transform_3, window_bounds = array<i64: 4, 64>}]} {
    %c0 = arith.constant 0 : index
    %c0_0 = arith.constant 0 : index
    %0 = vector.load %arg1[%c0, %c0_0] : memref<4x64xf32, #tpu.memory_space<vmem>>, vector<4x64xf32>
    %c0_1 = arith.constant 0 : index
    %c0_2 = arith.constant 0 : index
    %1 = vector.load %arg2[%c0_1, %c0_2] : memref<4x64xf32, #tpu.memory_space<vmem>>, vector<4x64xf32>
    %c0_3 = arith.constant 0 : index
    %c0_4 = arith.constant 0 : index
    %2 = vector.load %arg3[%c0_3, %c0_4] : memref<4x1xf32, #tpu.memory_space<vmem>>, vector<4x1xf32>
    %3 = arith.mulf %0, %0 : vector<4x64xf32>
    %cst = arith.constant dense<0.000000e+00> : vector<4xf32>
    %4 = vector.multi_reduction <add>, %3, %cst [1] : vector<4x64xf32> to vector<4xf32>
    %5 = vector.shape_cast %4 : vector<4xf32> to vector<4x1xf32>
    %6 = arith.mulf %0, %1 : vector<4x64xf32>
    %cst_5 = arith.constant dense<0.000000e+00> : vector<4xf32>
    %7 = vector.multi_reduction <add>, %6, %cst_5 [1] : vector<4x64xf32> to vector<4xf32>
    %8 = vector.shape_cast %7 : vector<4xf32> to vector<4x1xf32>
    %9 = arith.mulf %1, %1 : vector<4x64xf32>
    %cst_6 = arith.constant dense<0.000000e+00> : vector<4xf32>
    %10 = vector.multi_reduction <add>, %9, %cst_6 [1] : vector<4x64xf32> to vector<4xf32>
    %11 = vector.shape_cast %10 : vector<4xf32> to vector<4x1xf32>
    %cst_7 = arith.constant 1.000000e-30 : f32
    %12 = vector.broadcast %cst_7 : f32 to vector<4x1xf32>
    %13 = arith.maximumf %5, %12 : vector<4x1xf32>
    %14 = math.rsqrt %13 : vector<4x1xf32>
    %15 = arith.mulf %8, %14 : vector<4x1xf32>
    %16 = arith.mulf %15, %15 : vector<4x1xf32>
    %17 = arith.subf %11, %16 : vector<4x1xf32>
    %cst_8 = arith.constant 9.99999968E-21 : f32
    %18 = vector.broadcast %cst_8 : f32 to vector<4x1xf32>
    %19 = arith.maximumf %17, %18 : vector<4x1xf32>
    %20 = arith.mulf %2, %2 : vector<4x1xf32>
    %cst_9 = arith.constant 1.000000e+00 : f32
    %21 = vector.broadcast %cst_9 : f32 to vector<4x1xf32>
    %22 = arith.subf %21, %20 : vector<4x1xf32>
    %cst_10 = arith.constant 0.000000e+00 : f32
    %23 = vector.broadcast %cst_10 : f32 to vector<4x1xf32>
    %24 = arith.maximumf %22, %23 : vector<4x1xf32>
    %25 = math.sqrt %24 : vector<4x1xf32>
    %26 = math.rsqrt %19 : vector<4x1xf32>
    %27 = arith.mulf %26, %25 : vector<4x1xf32>
    %28 = arith.mulf %15, %27 : vector<4x1xf32>
    %29 = arith.subf %2, %28 : vector<4x1xf32>
    %30 = arith.mulf %14, %29 : vector<4x1xf32>
    %31 = vector.broadcast %27 : vector<4x1xf32> to vector<4x64xf32>
    %32 = arith.mulf %1, %31 : vector<4x64xf32>
    %33 = vector.broadcast %30 : vector<4x1xf32> to vector<4x64xf32>
    %34 = arith.mulf %0, %33 : vector<4x64xf32>
    %35 = arith.addf %32, %34 : vector<4x64xf32>
    %c0_11 = arith.constant 0 : index
    %c0_12 = arith.constant 0 : index
    %36 = vector.load %arg4[%c0_11, %c0_12] : memref<4x64xf32, #tpu.memory_space<vmem>>, vector<4x64xf32>
    tpu.vector_store %arg4[%c0_11, %c0_12], %35 {strides = array<i32>} : memref<4x64xf32, #tpu.memory_space<vmem>>, vector<4x64xf32>,
    return
  }
  func.func @transform_0(%arg0: i32) -> (i32, i32) {
    %c0_i32 = arith.constant 0 : i32
    %c0_i32_0 = arith.constant 0 : i32
    return %arg0, %c0_i32 : i32, i32
  }
  func.func @transform_1(%arg0: i32) -> (i32, i32) {
    %c0_i32 = arith.constant 0 : i32
    %c0_i32_0 = arith.constant 0 : i32
    return %arg0, %c0_i32 : i32, i32
  }
  func.func @transform_2(%arg0: i32) -> (i32, i32) {
    %c0_i32 = arith.constant 0 : i32
    %c0_i32_0 = arith.constant 0 : i32
    return %arg0, %c0_i32 : i32, i32
  }
  func.func @transform_3(%arg0: i32) -> (i32, i32) {
    %c0_i32 = arith.constant 0 : i32
    %c0_i32_0 = arith.constant 0 : i32
    return %arg0, %c0_i32 : i32, i32
  }
}

</mosaic_0001>

<bundles_post_ra>
// kernel: tpu_custom_call.1
= control target key start
LH: loop header
LB: loop body
LE: loop exit
PB: predicated region body
PF: predicated region fallthrough
CT: control target
= control target key end

     0   :  { %vm19_vm0 = vcmask 519168   ;;  %s161_s0 = inlined_call_operand.vmem [shape: f32[4,64], index: 0, kind: input, shape index: {}]   ;;  %s162_s1 = inlined_call_operand.vmem [shape: f32[4,64], index: 1, kind: input, shape index: {}]   ;;  %s163_s2 = inlined_call_operand.vmem [shape: f32[4,1], index: 2, kind: input, shape index: {}]   ;;  %s164_s3 = inlined_call_operand.hbm [shape: f32[4,64], index: 3, kind: output, shape index: {}]  }
   0x1   :  { %v15_v0 = vld [vmem:[%s161_s0] sm:$0xf] }
   0x2   :  { %v16_v1 = vld [vmem:[%s162_s1] sm:$0xf]  ;;  %v18_v2 = vmul.f32 %v15_v0, %v15_v0 }
   0x3   :  { %v23_v3 = vmul.f32 %v16_v1, %v15_v0  ;;  %v27_v4 = vmul.f32 %v16_v1, %v16_v1 }
   0x4   :  { %8 = vsyncpa [#allocation3], 0  ;;  %v20_v5 = vsel %vm19_vm0, %v18_v2, 0.0  ;;  %v114_v8 = vmov 0   ;;  %v17_v9 = vld [vmem:[%s163_s2] sm:$0xf] }
   0x5   :  { %v28_v6 = vsel %vm19_vm0, %v27_v4, 0.0  ;;  %21 = vadd.xlane.f32.xlu0 %v20_v5  ;;  %v24_v7 = vsel %vm19_vm0, %v23_v3, 0.0  ;;  %82 = vset.pattern.permute.xlu1 %v114_v8  ;;  %v37_v10 = vmul.f32 %v17_v9, %v17_v9  ;;  %s115_s1 = smov [#allocation2]  }
   0x6   :  { %29 = vadd.xlane.f32.xlu1 %v28_v6  ;;  %83 = vset.pattern.permute.xlu0 %v114_v8  ;;  %s72_s2 = sshll.u32 %s115_s1, 4  ;;  %s73_s2 = int_to_ptr.vmem [resolvable:$true] %s72_s2 }
   0x7   :  { %v38_v13 = vsub.f32 1.0, %v37_v10  ;;  %s90_s17 = scalar_lea.vmem %s73_s2, 64  ;;  %p95_p1 = scmp.lt.s32.totalorder %s73_s2, %s73_s2 }
   0x8   :  { %p91_p0 = scmp.ne.s32.totalorder %s73_s2, %s90_s17  ;;  %p96_p2 = scmp.lt.s32.totalorder %s90_s17, %s90_s17 }
   0x9   :  { %25 = vadd.xlane.f32.xlu0 %v24_v7  ;;  %v39_v14 = vmax.f32 %v38_v13, 0.0 }
   0xa   :  { %p97_p3 = por %p96_p2, %p95_p1 }
   0xb   :  { %vm42_vm1 = vcmp.eq.f32.partialorder %v39_v14, inf  ;;  %v45_v24 = vand.u32 2147483648, %v39_v14  ;;  %vm44_vm2 = vcmp.eq.f32.partialorder %v39_v14, 0.0 }
   0xc   :  { %p98_p4 = pnand %p97_p3, %p91_p0 }
  0x92   :  { %v22_v11 = vpop.xlane.xlu0 %21 }
  0x93   :  { %v31_v12 = vmax.f32 %v22_v11, 1e-30  ;;  %v30_v18 = vpop.xlane.xlu1 %29 }
  0x95   :  { %84 = vrsqrt.f32 %v31_v12 }
  0x96   :  { %86 = vrsqrt.f32 %v39_v14  ;;  %v26_v15 = vpop.xlane.xlu0 %25 }
  0x9f   :  { %v85_v16 = vpop.eup %84 }
  0xa0   :  { %v33_v17 = vmul.f32 %v85_v16, %v26_v15  ;;  %v87_v21 = vpop.eup %86 }
  0xa1   :  { %v41_v23 = vmul.f32 %v87_v21, %v39_v14 }
  0xa2   :  { %v34_v19 = vmul.f32 %v33_v17, %v33_v17 }
  0xa3   :  { %v43_v25 = vsel %vm42_vm1, %v39_v14, %v41_v23 }
  0xa4   :  { %v35_v20 = vsub.f32 %v30_v18, %v34_v19  ;;  %v46_v26 = vsel %vm44_vm2, %v45_v24, %v43_v25 }
  0xa6   :  { %v36_v22 = vmax.f32 %v35_v20, 1e-20 }
  0xa8   :  { %88 = vrsqrt.f32 %v36_v22 }
  0xb2   :  { %v89_v27 = vpop.eup %88 }
  0xb3   :  { %v48_v28 = vmul.f32 %v89_v27, %v46_v26 }
  0xb5   :  { %54 = vperm.xlu1 %82, %v48_v28   ;;  %v49_v29 = vmul.f32 %v48_v28, %v33_v17 }
  0xb7   :  { %v50_v30 = vsub.f32 %v17_v9, %v49_v29 }
  0xb9   :  { %v51_v31 = vmul.f32 %v85_v16, %v50_v30 }
  0xbb   :  { %60 = vperm.xlu0 %83, %v51_v31  }
 0x134   :  { %v55_v32 = vpop.permute.xlu1 %54 }
 0x135   :  { %v57_v34 = vmul.f32 %v55_v32, %v16_v1 }
 0x13a   :  { %v61_v33 = vpop.permute.xlu0 %60 }
 0x13b   :  { %v63_v35 = vmul.f32 %v61_v33, %v15_v0 }
 0x13d   :  { %v64_v36 = vadd.f32 %v63_v35, %v57_v34 }
 0x13f   :  { %65 = vst.msk [vmem:[#allocation2] sm:$0xf] %vm19_vm0, %v64_v36 }
 0x140   :  { %101 = shalt.err (!%p98_p4)
}
 0x141   :  { %s102_s20 = scalar_lea.hbm %s164_s3, 64 }
 0x142   :  { %p103_p5 = scmp.ne.s32.totalorder %s164_s3, %s102_s20  ;;  %p106_p6 = scmp.lt.u32.totalorder %s102_s20, %s164_s3 }
 0x144   :  { %p108_p7 = pnand %p106_p6, %p103_p5 }
 0x146   :  { %111 = shalt.err (!%p108_p7)
}
 0x147   :  { %75 = dma.vmem_to_hbm [thread:$0]  %s73_s2, 64, %s164_s3, [#allocation3]  }
 0x148   :  { %112 = dma.done.wait [#allocation3], 64  }
 0x149   :  { %113 = vsyncadd [#allocation3], 4294967232 }
 0x14a   :  { %79 = vsyncpa [#allocation3], 1 }

</bundles_post_ra>
